<compile_context>
chip_gen: v5e
topology: v5e:2x2
jax: 0.10.0
libtpu: 0.0.40
codegen_flags: <defaults>
</compile_context>

<pallas_src>
import math
from functools import partial

import jax
import jax.numpy as jnp
from jax.experimental import pallas as pl
from jax.experimental.pallas import tpu as pltpu


def _drop_path_kernel(mask_ref, x_ref, o_ref, *, tb, batch_axis):
    # mask_ref: (B_pad, 1), resident (same block every grid step).
    # x_ref / o_ref: (TB, TF) tiles.
    bi = pl.program_id(batch_axis)
    row0 = pl.multiple_of(bi * tb, tb)
    m = mask_ref[pl.ds(row0, tb), :]          # (TB, 1), already in x.dtype
    o_ref[...] = x_ref[...] * m               # broadcast over the lane axis


def drop_path_pallas(x, drop_prob: float = 0.0, *, key=None,
                     training: bool = False, scale_by_keep: bool = True,
                     donate_x: bool = False):
    """Pallas TPU implementation of timm-style drop_path(). x is any rank >= 1."""
    if drop_prob == 0.0 or not training:
        return x
    if key is None:
        raise ValueError("drop_path_pallas: a fresh PRNG key is required when "
                         "training with drop_prob > 0 (stochastic depth).")

    keep_prob = 1.0 - drop_prob
    B = x.shape[0]
    F = int(math.prod(x.shape[1:]))
    dtype_bytes = jnp.dtype(x.dtype).itemsize

    # ---- Tile selection ------------------------------------------------------
    # Feature tile: full axis when modest (no padding needed for any F), else a
    # lane-dense 8192-wide tile with a masked partial edge tile.
    MAX_TF = 8192
    TF = F if F <= MAX_TF else MAX_TF

    # Batch tile: ~4 MiB blocks to amortize per-step pipeline overhead.
    target_block_bytes = 4 * 1024 * 1024
    tb_budget = max(1, target_block_bytes // max(1, TF * dtype_bytes))
    if tb_budget >= B or B <= 8:
        TB = B                                 # full batch axis in one block
    else:
        TB = max(8, (min(tb_budget, B) // 8) * 8)   # sublane-aligned

    grid_b = pl.cdiv(B, TB)
    grid_f = pl.cdiv(F, TF)

    # Put the axis with more blocks first so v7x megacore sharding always has
    # >= 2 blocks to split across its two TensorCores (no-op on v5e/v6e).
    batch_first = grid_b >= grid_f
    if batch_first:
        grid = (grid_b, grid_f)
        x_index = lambda i, j: (i, j)
        batch_axis = 0
    else:
        grid = (grid_f, grid_b)
        x_index = lambda i, j: (j, i)
        batch_axis = 1

    # ---- Per-sample mask (tiny; built in plain JAX, fully resident in VMEM) --
    keep = jax.random.bernoulli(key, p=keep_prob, shape=(B, 1))
    scale = (1.0 / keep_prob) if (scale_by_keep and keep_prob > 0.0) else 1.0
    mask = (keep.astype(jnp.float32) * jnp.float32(scale)).astype(x.dtype)

    B_pad = grid_b * TB                        # pad the tiny mask, never x
    if B_pad != B:
        mask = jnp.pad(mask, ((0, B_pad - B), (0, 0)))

    x2d = x.reshape(B, F)

    cost = pl.CostEstimate(
        flops=B * F,
        transcendentals=0,
        bytes_accessed=2 * B * F * dtype_bytes + B_pad * dtype_bytes,
    )

    out2d = pl.pallas_call(
        partial(_drop_path_kernel, tb=TB, batch_axis=batch_axis),
        out_shape=jax.ShapeDtypeStruct((B, F), x.dtype),
        grid=grid,
        in_specs=[
            # Resident mask: constant block index -> fetched once, no stream.
            pl.BlockSpec((B_pad, 1), lambda i, j: (0, 0)),
            pl.BlockSpec((TB, TF), x_index),
        ],
        out_specs=pl.BlockSpec((TB, TF), x_index),
        compiler_params=pltpu.CompilerParams(
            dimension_semantics=("parallel", "parallel"),
            vmem_limit_bytes=32 * 1024 * 1024,
        ),
        cost_estimate=cost,
        input_output_aliases=({1: 0} if donate_x else {}),
    )(mask, x2d)

    return out2d.reshape(x.shape)


if __name__ == "__main__":
    root = jax.random.PRNGKey(0)
    kx, kmask, kx2, kmask2 = jax.random.split(root, 4)

    # Small NCHW-style activation: (B, C, H, W) with a 128-aligned feature axis.
    x = jax.random.normal(kx, (2, 4, 16, 16), dtype=jnp.float32)
    drop_prob = 0.25
    keep_prob = 1.0 - drop_prob

    # Training mode: per-sample stochastic depth.
    y = drop_path_pallas(x, drop_prob, key=kmask, training=True, scale_by_keep=True)
    y = jax.block_until_ready(y)

    # Sanity: every sample is either exactly zero or x / keep_prob.
    y2 = y.reshape(y.shape[0], -1)
    x2 = x.reshape(x.shape[0], -1)
    for b in range(x.shape[0]):
        is_dropped = bool(jnp.all(y2[b] == 0.0))
        is_kept = bool(jnp.allclose(y2[b], x2[b] / keep_prob, rtol=1e-6, atol=1e-6))
        assert is_dropped or is_kept, f"sample {b} mask semantics violated"

    # Non-128-aligned feature axis: exercises the full-dim-tile (no-pad) path.
    xo = jax.random.normal(kx2, (5, 3, 10, 10), dtype=jnp.float32)
    yo = jax.block_until_ready(
        drop_path_pallas(xo, drop_prob, key=kmask2, training=True))
    yo2 = yo.reshape(yo.shape[0], -1)
    xo2 = xo.reshape(xo.shape[0], -1)
    for b in range(xo.shape[0]):
        is_dropped = bool(jnp.all(yo2[b] == 0.0))
        is_kept = bool(jnp.allclose(yo2[b], xo2[b] / keep_prob, rtol=1e-6, atol=1e-6))
        assert is_dropped or is_kept, f"odd-shape sample {b} mask semantics violated"

    # Eval mode / zero drop prob: identity.
    y_eval = drop_path_pallas(x, drop_prob, key=kmask, training=False)
    assert bool(jnp.array_equal(y_eval, x))
    y_zero = drop_path_pallas(x, 0.0, training=True)
    assert bool(jnp.array_equal(y_zero, x))

    print("KERNEL_OK")
</pallas_src>

<mosaic_0001>
module attributes {stable_mosaic.version = 11 : i64} {
  func.func @_drop_path_kernel(%arg0: i32, %arg1: i32, %arg2: memref<2x1xf32, #tpu.memory_space<vmem>>, %arg3: memref<2x1024xf32, #tpu.memory_space<vmem>>, %arg4: memref<2x1024xf32, #tpu.memory_space<vmem>>) attributes {dimension_semantics = [#tpu.dimension_semantics<parallel>, #tpu.dimension_semantics<parallel>], iteration_bounds = array<i64: 1, 1>, scalar_prefetch = 0 : i64, scratch_operands = 0 : i64, tpu.core_type = #tpu.core_type<tc>, window_params = [{pipeline_mode = #tpu.pipeline_mode<synchronous>, transform_indices = @transform_0, window_bounds = array<i64: 2, 1>}, {transform_indices = @transform_1, window_bounds = array<i64: 2, 1024>}, {transform_indices = @transform_2, window_bounds = array<i64: 2, 1024>}]} {
    %c2_i32 = arith.constant 2 : i32
    %0 = arith.muli %arg0, %c2_i32 : i32
    %1 = tpu.assume_multiple %0, 2 : i32
    %2 = arith.index_cast %1 : i32 to index
    %c0 = arith.constant 0 : index
    %3 = vector.load %arg2[%2, %c0] : memref<2x1xf32, #tpu.memory_space<vmem>>, vector<2x1xf32>
    %c0_0 = arith.constant 0 : index
    %c0_1 = arith.constant 0 : index
    %4 = vector.load %arg3[%c0_0, %c0_1] : memref<2x1024xf32, #tpu.memory_space<vmem>>, vector<2x1024xf32>
    %5 = vector.broadcast %3 : vector<2x1xf32> to vector<2x1024xf32>
    %6 = arith.mulf %4, %5 : vector<2x1024xf32>
    %c0_2 = arith.constant 0 : index
    %c0_3 = arith.constant 0 : index
    %7 = vector.load %arg4[%c0_2, %c0_3] : memref<2x1024xf32, #tpu.memory_space<vmem>>, vector<2x1024xf32>
    tpu.vector_store %arg4[%c0_2, %c0_3], %6 {strides = array<i32>} : memref<2x1024xf32, #tpu.memory_space<vmem>>, vector<2x1024xf32>,
    return
  }
  func.func @transform_0(%arg0: i32, %arg1: i32) -> (i32, i32) {
    %c0_i32 = arith.constant 0 : i32
    %c0_i32_0 = arith.constant 0 : i32
    %c0_i32_1 = arith.constant 0 : i32
    return %c0_i32, %c0_i32_0 : i32, i32
  }
  func.func @transform_1(%arg0: i32, %arg1: i32) -> (i32, i32) {
    %c0_i32 = arith.constant 0 : i32
    return %arg0, %arg1 : i32, i32
  }
  func.func @transform_2(%arg0: i32, %arg1: i32) -> (i32, i32) {
    %c0_i32 = arith.constant 0 : i32
    return %arg0, %arg1 : i32, i32
  }
}

</mosaic_0001>

<bundles_post_ra>
// kernel: tpu_custom_call.1
= control target key start
LH: loop header
LB: loop body
LE: loop exit
PB: predicated region body
PF: predicated region fallthrough
CT: control target
= control target key end

     0   :  { %7 = vsyncpa [#allocation3], 0  ;;  %s146_s0 = inlined_call_operand.vmem [shape: f32[2,1], index: 0, kind: input, shape index: {}]   ;;  %s147_s1 = inlined_call_operand.hbm [shape: f32[2,1024], index: 1, kind: input, shape index: {}]   ;;  %s148_s2 = inlined_call_operand.hbm [shape: f32[2,1024], index: 2, kind: output, shape index: {}]  }
   0x1   :  { %8 = vsyncpa [#allocation4], 0  ;;  %s16_s11 = sshll.u32 %s147_s1, 4  ;;  %s118_s12 = smov [#allocation2]   ;;  %s17_s11 = int_to_ptr.hbm [resolvable:$true] %s16_s11 }
   0x2   :  { %s18_s13 = sshll.u32 %s118_s12, 4  ;;  %s19_s13 = int_to_ptr.vmem [resolvable:$true] %s18_s13 }
   0x3   :  { %21 = dma.hbm_to_vmem [thread:$0]  %s17_s11, 256, %s19_s13, [#allocation3]  }
   0x4   :  { %114 = dma.done.wait [#allocation3], 256  }
   0x5   :  { %115 = vsyncadd [#allocation3], 4294967040  ;;  %v119_v0 = vmov 0   ;;  %v28_v1 = vld [vmem:[%s146_s0] sm:$0x3]  ;;  %v30_v6 = vld [vmem:[#allocation2 + $0x8] sm:$0xff] }
   0x6   :  { %65 = vset.pattern.permute.xlu0 %v119_v0  ;;  %v120_v2 = vmov 269488144   ;;  %v29_v5 = vld [vmem:[#allocation2] sm:$0xff]  ;;  %s121_s1 = smov [#allocation5]   ;;  %s51_s19 = sshll.u32 %s148_s2, 4  ;;  %s52_s19 = int_to_ptr.hbm [resolvable:$true] %s51_s19 }
   0x7   :  { %33 = vperm.xlu0 %65, %v28_v1   ;;  %v36_v3 = vunpack.c.l.s4 %v120_v2  ;;  %s49_s16 = sshll.u32 %s121_s1, 4  ;;  %s50_s16 = int_to_ptr.vmem [resolvable:$true] %s49_s16 }
   0x9   :  { %v37_v4 = vunpack.c.0.s8 %v36_v3 }
  0x79   :  { %v34_v7 = vpop.permute.xlu0 %33 }
  0x7a   :  { %v38_v8 = vperm.slane %v34_v7, %v37_v4 }
  0x7c   :  { %v40_v9 = vmul.f32 %v38_v8, %v29_v5  ;;  %v41_v10 = vmul.f32 %v38_v8, %v30_v6 }
  0x7e   :  { %42 = vst [vmem:[#allocation5] sm:$0xff] %v40_v9 }
  0x7f   :  { %43 = vst [vmem:[#allocation5 + $0x8] sm:$0xff] %v41_v10 }
  0x80   :  { %54 = dma.vmem_to_hbm [thread:$0]  %s50_s16, 256, %s52_s19, [#allocation4]  }
  0x81   :  { %116 = dma.done.wait [#allocation4], 256  }
  0x82   :  { %117 = vsyncadd [#allocation4], 4294967040 }
  0x83   :  { %59 = vsyncpa [#allocation3], 1 }
  0x84   :  { %60 = vsyncpa [#allocation4], 1 }

</bundles_post_ra>
